<compile_context>
chip_gen: v7x
topology: tpu7x:2x2x1
jax: 0.10.0
libtpu: 0.0.40
codegen_flags: <defaults>
</compile_context>

<pallas_src>
import jax
import jax.numpy as jnp
from jax.experimental import pallas as pl
from jax.experimental.pallas import tpu as pltpu

NUM_NODE_TYPES = 120      # Embedding(120, hidden_dim) in the PyTorch module
NUM_TYPES_PADDED = 128    # lane-dense padded type table


def _encoder_kernel(x_ref, type_ref, w1_ref, b1_ref, w2_ref, b2_ref,
                    type_emb_ref, out_ref):
    # x_ref: [BN, D] f32, type_ref: [BN, 1] int32,
    # w1: [D, H] bf16, w2: [H, H] bf16, b1/b2: [1, H] f32,
    # type_emb: [128, H] f32, out: [BN, H] out_dtype.

    # In-kernel activation cast (saves a separate XLA cast pass + HBM round trip).
    x = x_ref[...].astype(jnp.bfloat16)

    # --- MLP: Linear -> ReLU -> Linear (bf16 operands, f32 accumulation) ----
    h = jnp.dot(x, w1_ref[...], preferred_element_type=jnp.float32) + b1_ref[...]
    h = jnp.maximum(h, 0.0)
    x1 = jnp.dot(h.astype(jnp.bfloat16), w2_ref[...],
                 preferred_element_type=jnp.float32) + b2_ref[...]

    # --- Embedding lookup via one-hot matmul (exact: 0/1 one-hot, f32 table) -
    t = type_ref[...]                                            # [BN, 1] int32
    bn = t.shape[0]
    iota = jax.lax.broadcasted_iota(jnp.int32, (bn, NUM_TYPES_PADDED), 1)
    onehot = (iota == t).astype(jnp.float32)                     # [BN, 128]
    x2 = jnp.dot(onehot, type_emb_ref[...],
                 preferred_element_type=jnp.float32)             # [BN, H] f32

    # --- Gate ----------------------------------------------------------------
    out_ref[...] = (x1 * x2).astype(out_ref.dtype)


def prepare_params(params):
    """One-time preprocessing (hoist out of the per-call path): cast the MLP
    weights to bf16 and zero-pad the 120-row type table to 128 lane-dense rows
    (kept in f32 so embedding values match nn.Embedding exactly)."""
    type_emb = params["type_emb"]
    pad_rows = NUM_TYPES_PADDED - type_emb.shape[0]
    if pad_rows > 0:
        type_emb = jnp.pad(type_emb, ((0, pad_rows), (0, 0)))
    return {
        "w1": params["w1"].astype(jnp.bfloat16),
        "b1": params["b1"].reshape(1, -1).astype(jnp.float32),
        "w2": params["w2"].astype(jnp.bfloat16),
        "b2": params["b2"].reshape(1, -1).astype(jnp.float32),
        "type_emb": type_emb.astype(jnp.float32),
    }


def _round_up(x, m):
    return ((x + m - 1) // m) * m


def _choose_block_n(n, block_n):
    """Pick the node tile: as big as requested, but keep >= 2 grid steps
    (megacore sharding on v7x) and a multiple of 8 sublanes."""
    if n <= 8:
        return n                                  # single tiny block (== full dim)
    half = _round_up(pl.cdiv(n, 2), 8)            # ensures grid >= 2
    return max(8, min(block_n, half))


def mlp_node_encoder(node_emb, node_type, prepared_params, *,
                     block_n=1024, out_dtype=jnp.float32):
    """node_emb: [N, node_dim] f32; node_type: [N] int32 in [0, 120).
    prepared_params: output of prepare_params()."""
    n, node_dim = node_emb.shape
    hidden = prepared_params["w1"].shape[1]
    assert hidden % 128 == 0, "hidden_dim must be a multiple of 128 (lane-dense)"

    bn = _choose_block_n(n, block_n)
    grid = (pl.cdiv(n, bn),)

    types2d = node_type.astype(jnp.int32).reshape(n, 1)

    d, h = node_dim, hidden
    out_bytes = jnp.dtype(out_dtype).itemsize
    flops = 2 * n * (d * h + h * h + NUM_TYPES_PADDED * h)
    bytes_accessed = (n * d * 4 + n * 4 + n * h * out_bytes
                      + (d * h + h * h) * 2
                      + NUM_TYPES_PADDED * h * 4 + 2 * h * 4)

    return pl.pallas_call(
        _encoder_kernel,
        out_shape=jax.ShapeDtypeStruct((n, hidden), out_dtype),
        grid_spec=pltpu.PrefetchScalarGridSpec(
            num_scalar_prefetch=0,
            grid=grid,
            in_specs=[
                pl.BlockSpec((bn, d), lambda i: (i, 0)),               # node_emb tile (f32)
                pl.BlockSpec((bn, 1), lambda i: (i, 0)),               # node_type tile
                pl.BlockSpec((d, h), lambda i: (0, 0)),                # w1 (resident)
                pl.BlockSpec((1, h), lambda i: (0, 0)),                # b1 (resident)
                pl.BlockSpec((h, h), lambda i: (0, 0)),                # w2 (resident)
                pl.BlockSpec((1, h), lambda i: (0, 0)),                # b2 (resident)
                pl.BlockSpec((NUM_TYPES_PADDED, h), lambda i: (0, 0)), # type table (f32)
            ],
            out_specs=pl.BlockSpec((bn, h), lambda i: (i, 0)),
        ),
        compiler_params=pltpu.CompilerParams(
            dimension_semantics=("parallel",),        # megacore sharding on v7x
            vmem_limit_bytes=32 * 1024 * 1024,        # v5e default is only 16 MiB
        ),
        cost_estimate=pl.CostEstimate(flops=flops, transcendentals=0,
                                      bytes_accessed=bytes_accessed),
    )(node_emb.astype(jnp.float32), types2d,
      prepared_params["w1"], prepared_params["b1"],
      prepared_params["w2"], prepared_params["b2"],
      prepared_params["type_emb"])


def init_params(key, node_dim, hidden_dim):
    """Deterministic synthetic parameters. Linear weights stored as [in, out]."""
    ks = jax.random.split(key, 5)
    scale = 0.1
    return {
        "w1": scale * jax.random.normal(ks[0], (node_dim, hidden_dim), jnp.float32),
        "b1": scale * jax.random.normal(ks[1], (1, hidden_dim), jnp.float32),
        "w2": scale * jax.random.normal(ks[2], (hidden_dim, hidden_dim), jnp.float32),
        "b2": scale * jax.random.normal(ks[3], (1, hidden_dim), jnp.float32),
        "type_emb": scale * jax.random.normal(ks[4], (NUM_NODE_TYPES, hidden_dim),
                                              jnp.float32),
    }


def reference(node_emb, node_type, params):
    h = jnp.maximum(node_emb @ params["w1"] + params["b1"], 0.0)
    x1 = h @ params["w2"] + params["b2"]
    x2 = params["type_emb"][node_type]
    return x1 * x2


if __name__ == "__main__":
    N, NODE_DIM, HIDDEN = 256, 32, 128

    key = jax.random.PRNGKey(0)
    k_emb, k_typ, k_par = jax.random.split(key, 3)

    node_emb = jax.random.normal(k_emb, (N, NODE_DIM), jnp.float32)
    node_type = jax.random.randint(k_typ, (N,), 0, NUM_NODE_TYPES, jnp.int32)
    params = init_params(k_par, NODE_DIM, HIDDEN)
    prepared = prepare_params(params)          # hoisted one-time preprocessing

    # Default f32 output (matches the PyTorch module's dtype).
    out = mlp_node_encoder(node_emb, node_type, prepared)
    out = jax.block_until_ready(out)

    ref = reference(node_emb, node_type, params)
    assert out.shape == (N, HIDDEN)
    # bf16 MLP matmul operands with f32 accumulation -> relaxed tolerance.
    assert jnp.allclose(out, ref, atol=2e-2, rtol=2e-2)

    # Optional bf16 output path (halves HBM writeback; use if downstream allows).
    out_bf16 = mlp_node_encoder(node_emb, node_type, prepared,
                                out_dtype=jnp.bfloat16)
    out_bf16 = jax.block_until_ready(out_bf16)
    assert out_bf16.shape == (N, HIDDEN) and out_bf16.dtype == jnp.bfloat16
    assert jnp.allclose(out_bf16.astype(jnp.float32), ref, atol=5e-2, rtol=5e-2)

    print("KERNEL_OK")
</pallas_src>

<mosaic_0001>
module attributes {stable_mosaic.version = 11 : i64} {
  func.func @_encoder_kernel(%arg0: i32, %arg1: memref<128x32xf32, #tpu.memory_space<vmem>>, %arg2: memref<128x1xi32, #tpu.memory_space<vmem>>, %arg3: memref<32x128xbf16, #tpu.memory_space<vmem>>, %arg4: memref<1x128xf32, #tpu.memory_space<vmem>>, %arg5: memref<128x128xbf16, #tpu.memory_space<vmem>>, %arg6: memref<1x128xf32, #tpu.memory_space<vmem>>, %arg7: memref<128x128xf32, #tpu.memory_space<vmem>>, %arg8: memref<128x128xf32, #tpu.memory_space<vmem>>) attributes {dimension_semantics = [#tpu.dimension_semantics<parallel>], iteration_bounds = array<i64: 2>, scalar_prefetch = 0 : i64, scratch_operands = 0 : i64, tpu.core_type = #tpu.core_type<tc>, window_params = [{transform_indices = @transform_0, window_bounds = array<i64: 128, 32>}, {transform_indices = @transform_1, window_bounds = array<i64: 128, 1>}, {pipeline_mode = #tpu.pipeline_mode<synchronous>, transform_indices = @transform_2, window_bounds = array<i64: 32, 128>}, {pipeline_mode = #tpu.pipeline_mode<synchronous>, transform_indices = @transform_3, window_bounds = array<i64: 1, 128>}, {pipeline_mode = #tpu.pipeline_mode<synchronous>, transform_indices = @transform_4, window_bounds = array<i64: 128, 128>}, {pipeline_mode = #tpu.pipeline_mode<synchronous>, transform_indices = @transform_5, window_bounds = array<i64: 1, 128>}, {pipeline_mode = #tpu.pipeline_mode<synchronous>, transform_indices = @transform_6, window_bounds = array<i64: 128, 128>}, {transform_indices = @transform_7, window_bounds = array<i64: 128, 128>}]} {
    %c0 = arith.constant 0 : index
    %c0_0 = arith.constant 0 : index
    %0 = vector.load %arg1[%c0, %c0_0] : memref<128x32xf32, #tpu.memory_space<vmem>>, vector<128x32xf32>
    %1 = arith.truncf %0 : vector<128x32xf32> to vector<128x32xbf16>
    %c0_1 = arith.constant 0 : index
    %c0_2 = arith.constant 0 : index
    %2 = vector.load %arg3[%c0_1, %c0_2] : memref<32x128xbf16, #tpu.memory_space<vmem>>, vector<32x128xbf16>
    %cst = arith.constant dense<0.000000e+00> : vector<128x128xf32>
    %3 = tpu.matmul %1, %2, %cst {dimension_numbers = #tpu.dot_dimension_numbers<[1], [0], [0], [1], [0, 0, 1, 1], [], []>} : vector<128x32xbf16>, vector<32x128xbf16>, vector<128x128xf32> -> vector<128x128xf32>
    %c0_3 = arith.constant 0 : index
    %c0_4 = arith.constant 0 : index
    %4 = vector.load %arg4[%c0_3, %c0_4] : memref<1x128xf32, #tpu.memory_space<vmem>>, vector<1x128xf32>
    %5 = vector.broadcast %4 : vector<1x128xf32> to vector<128x128xf32>
    %6 = arith.addf %3, %5 : vector<128x128xf32>
    %cst_5 = arith.constant 0.000000e+00 : f32
    %7 = vector.broadcast %cst_5 : f32 to vector<128x128xf32>
    %8 = arith.maximumf %6, %7 : vector<128x128xf32>
    %9 = arith.truncf %8 : vector<128x128xf32> to vector<128x128xbf16>
    %c0_6 = arith.constant 0 : index
    %c0_7 = arith.constant 0 : index
    %10 = vector.load %arg5[%c0_6, %c0_7] : memref<128x128xbf16, #tpu.memory_space<vmem>>, vector<128x128xbf16>
    %cst_8 = arith.constant dense<0.000000e+00> : vector<128x128xf32>
    %11 = tpu.matmul %9, %10, %cst_8 {dimension_numbers = #tpu.dot_dimension_numbers<[1], [0], [0], [1], [0, 0, 1, 1], [], []>} : vector<128x128xbf16>, vector<128x128xbf16>, vector<128x128xf32> -> vector<128x128xf32>
    %c0_9 = arith.constant 0 : index
    %c0_10 = arith.constant 0 : index
    %12 = vector.load %arg6[%c0_9, %c0_10] : memref<1x128xf32, #tpu.memory_space<vmem>>, vector<1x128xf32>
    %13 = vector.broadcast %12 : vector<1x128xf32> to vector<128x128xf32>
    %14 = arith.addf %11, %13 : vector<128x128xf32>
    %c0_11 = arith.constant 0 : index
    %c0_12 = arith.constant 0 : index
    %15 = vector.load %arg2[%c0_11, %c0_12] : memref<128x1xi32, #tpu.memory_space<vmem>>, vector<128x1xi32>
    %16 = tpu.iota {dimensions = array<i32: 1>} : vector<128x128xi32>
    %17 = vector.broadcast %15 : vector<128x1xi32> to vector<128x128xi32>
    %18 = arith.cmpi eq, %16, %17 : vector<128x128xi32>
    %19 = arith.extui %18 : vector<128x128xi1> to vector<128x128xi32>
    %20 = arith.sitofp %19 : vector<128x128xi32> to vector<128x128xf32>
    %c0_13 = arith.constant 0 : index
    %c0_14 = arith.constant 0 : index
    %21 = vector.load %arg7[%c0_13, %c0_14] : memref<128x128xf32, #tpu.memory_space<vmem>>, vector<128x128xf32>
    %cst_15 = arith.constant dense<0.000000e+00> : vector<128x128xf32>
    %22 = tpu.matmul %20, %21, %cst_15 {dimension_numbers = #tpu.dot_dimension_numbers<[1], [0], [0], [1], [0, 0, 1, 1], [], []>} : vector<128x128xf32>, vector<128x128xf32>, vector<128x128xf32> -> vector<128x128xf32>
    %23 = arith.mulf %14, %22 : vector<128x128xf32>
    %c0_16 = arith.constant 0 : index
    %c0_17 = arith.constant 0 : index
    %24 = vector.load %arg8[%c0_16, %c0_17] : memref<128x128xf32, #tpu.memory_space<vmem>>, vector<128x128xf32>
    tpu.vector_store %arg8[%c0_16, %c0_17], %23 {strides = array<i32>} : memref<128x128xf32, #tpu.memory_space<vmem>>, vector<128x128xf32>,
    return
  }
  func.func @transform_0(%arg0: i32) -> (i32, i32) {
    %c0_i32 = arith.constant 0 : i32
    %c0_i32_0 = arith.constant 0 : i32
    return %arg0, %c0_i32 : i32, i32
  }
  func.func @transform_1(%arg0: i32) -> (i32, i32) {
    %c0_i32 = arith.constant 0 : i32
    %c0_i32_0 = arith.constant 0 : i32
    return %arg0, %c0_i32 : i32, i32
  }
  func.func @transform_2(%arg0: i32) -> (i32, i32) {
    %c0_i32 = arith.constant 0 : i32
    %c0_i32_0 = arith.constant 0 : i32
    %c0_i32_1 = arith.constant 0 : i32
    return %c0_i32, %c0_i32_0 : i32, i32
  }
  func.func @transform_3(%arg0: i32) -> (i32, i32) {
    %c0_i32 = arith.constant 0 : i32
    %c0_i32_0 = arith.constant 0 : i32
    %c0_i32_1 = arith.constant 0 : i32
    return %c0_i32, %c0_i32_0 : i32, i32
  }
  func.func @transform_4(%arg0: i32) -> (i32, i32) {
    %c0_i32 = arith.constant 0 : i32
    %c0_i32_0 = arith.constant 0 : i32
    %c0_i32_1 = arith.constant 0 : i32
    return %c0_i32, %c0_i32_0 : i32, i32
  }
  func.func @transform_5(%arg0: i32) -> (i32, i32) {
    %c0_i32 = arith.constant 0 : i32
    %c0_i32_0 = arith.constant 0 : i32
    %c0_i32_1 = arith.constant 0 : i32
    return %c0_i32, %c0_i32_0 : i32, i32
  }
  func.func @transform_6(%arg0: i32) -> (i32, i32) {
    %c0_i32 = arith.constant 0 : i32
    %c0_i32_0 = arith.constant 0 : i32
    %c0_i32_1 = arith.constant 0 : i32
    return %c0_i32, %c0_i32_0 : i32, i32
  }
  func.func @transform_7(%arg0: i32) -> (i32, i32) {
    %c0_i32 = arith.constant 0 : i32
    %c0_i32_0 = arith.constant 0 : i32
    return %arg0, %c0_i32 : i32, i32
  }
}

</mosaic_0001>

<bundles_post_ra>
// kernel: tpu_custom_call.1
= control target key start
LH: loop header
LB: loop body
LE: loop exit
PB: predicated region body
PF: predicated region fallthrough
CT: control target
= control target key end

     0   :  { %12 = vsyncpa [#allocation3], 0  ;;  %s1878_s0 = inlined_call_operand.vmem [shape: f32[256,32], index: 0, kind: input, shape index: {}]   ;;  %s1879_s1 = inlined_call_operand.vmem [shape: s32[256,1], index: 1, kind: input, shape index: {}]   ;;  %s1880_s2 = inlined_call_operand.vmem [shape: bf16[32,128], index: 2, kind: input, shape index: {}]   ;;  %s1881_s3 = inlined_call_operand.vmem [shape: f32[1,128], index: 3, kind: input, shape index: {}]   ;;  %s1882_s4 = inlined_call_operand.vmem [shape: bf16[128,128], index: 4, kind: input, shape index: {}]   ;;  %s1883_s5 = inlined_call_operand.vmem [shape: f32[1,128], index: 5, kind: input, shape index: {}]   ;;  %s1884_s6 = inlined_call_operand.vmem [shape: f32[128,128], index: 6, kind: input, shape index: {}]   ;;  %s1885_s7 = inlined_call_operand.hbm [shape: f32[256,128], index: 7, kind: output, shape index: {}]  }
   0x1   :  { %14 = vsyncpa [#allocation3 + $0x1], 0  ;;  %s1504_s24 = smov 0   ;;  %s1506_s25 = smov 0  }
   0x2   :  { %s1508_s26 = smov 0   ;;  %s1510_s27 = smov 0  }
   0x3 LB: > { %s1525_s28 = sadd.s32 4294967295, %s1457_s27   ;;  %s1059_s29 = sadd.s32 4294967294, %s1457_s27   ;;  %s1457_s27 = sphi %s1510_s27, %s1891_s27   ;;  %s1453_s26 = sphi %s1508_s26, %s1890_s26   ;;  %s1449_s25 = sphi %s1506_s25, %s1889_s25   ;;  %s1445_s24 = sphi %s1504_s24, %s1888_s24  }
   0x4   : > { %s1529_s30 = sadd.s32 1, %s1457_s27   ;;  %s184_s8 = sadd.s32 1, %s1453_s26 }
   0x5   : > { %s181_s9 = ssub.s32 %s1457_s27, %s1529_s30  ;;  %p194_p0 = scmp.ne.s32.totalorder %s1453_s26, %s1449_s25 }
   0x6   : > { %p182_p1 = scmp.eq.s32.totalorder %s181_s9, 0  ;;  %p195_p2 = scmp.eq.s32.totalorder %s1525_s28, 1 }
   0x7   : > { %p200_p3 = scmp.ne.s32.totalorder %s1449_s25, %s1445_s24  ;;  %p201_p4 = scmp.eq.s32.totalorder %s1059_s29, 1 }
   0x8   : > { %s1540_s10 = scalar_select %p182_p1, %s1453_s26, %s184_s8  }
   0x9   : > { %p1542_p5 = por %p195_p2, %p194_p0  ;;  %p1546_p6 = por %p201_p4, %p200_p3 }
   0xa   : > { %p1062_p7 = scmp.ge.s32.totalorder %s1457_s27, 1  ;;  %p252_p8 = scmp.lt.s32.totalorder %s1457_s27, 3 }
   0xc   : > { %p253_p9 = pnand %p1062_p7, %p252_p8 }
   0xd   : > { %v1385_v0 = vld [vmem:[%s1880_s2] sm:$0xff] (!%p253_p9)   ;;  %s1064_s15 = sshll.u32 (!%p253_p9), %s1525_s28, 4  ;;  %v1386_v1 = vld [vmem:[%s1880_s2 + $0x8] sm:$0xff] (!%p253_p9)   ;;  %v1459_v4 = vmov (!%p253_p9), 0   ;;  %v780_v6 = vld [vmem:[%s1884_s6 + $0x10] sm:$0xff] (!%p253_p9)  ;;  %vm350_vm0 = vcmask (!%p253_p9), 261120  }
   0xe   : > { %256 = sbr.rel (%p253_p9) target bundleno = 512 (0x200), region = 48  ;;  %p290_p10 = scmp.lt.s32.totalorder (!%p253_p9), %s1064_s15, 31  ;;  %1184 = vmatprep.subr.bf16.mxu0 (!%p253_p9), %v1385_v0  ;;  %v778_v2 = vld [vmem:[%s1884_s6] sm:$0xff] (!%p253_p9)  ;;  %v779_v3 = vld [vmem:[%s1884_s6 + $0x8] sm:$0xff] (!%p253_p9)  ;;  %1383 = vset.pattern.permute.xlu0 (!%p253_p9), %v1459_v4  ;;  %v781_v7 = vld [vmem:[%s1884_s6 + $0x18] sm:$0xff] (!%p253_p9) }
   0xf   : > { %1185 = vmatpush3.bf16.msra.mxu0 (!%p253_p9), %v1385_v0  ;;  %1384 = vset.pattern.permute.xlu1 (!%p253_p9), %v1459_v4  ;;  %v1565_v5 = vpack.c.bf16 (!%p253_p9), %v779_v3, %v778_v2  ;;  %v1387_v8 = vld [vmem:[%s1882_s4] sm:$0xff] (!%p253_p9)   ;;  %v1594_v18 = vpack.c.bf16 (!%p253_p9), %v781_v7, %v780_v6  ;;  %v783_v21 = vld [vmem:[%s1884_s6 + $0x28] sm:$0xff] (!%p253_p9)  ;;  %v784_v31 = vld [vmem:[%s1884_s6 + $0x30] sm:$0xff] (!%p253_p9)  ;;  %s286_s29 = sand.u32 (!%p253_p9), 1, %s1449_s25   ;;  %s1125_s14 = sshll.u32 (!%p253_p9), %s1525_s28, 11 }
  0x10   : > { %1186 = vmatprep.subr.bf16.mxu0 (!%p253_p9), %v1386_v1  ;;  %1204 = vmatprep.subr.bf16.mxu1 (!%p253_p9), %v1387_v8  ;;  %v782_v20 = vld [vmem:[%s1884_s6 + $0x20] sm:$0xff] (!%p253_p9)  ;;  %v785_v32 = vld [vmem:[%s1884_s6 + $0x38] sm:$0xff] (!%p253_p9)  ;;  %v787_v36 = vld [vmem:[%s1884_s6 + $0x48] sm:$0xff] (!%p253_p9)  ;;  %s1829_s18 = scalar_lea.hbm (!%p253_p9), %s1885_s7, %s1125_s14  ;;  %s1837_s28 = scalar_lea.sflag (!%p253_p9), [#allocation3], %s286_s29 }
  0x11   : > { %1205 = vmatpush3.bf16.msra.mxu1 (!%p253_p9), %v1387_v8  ;;  %v1614_v29 = vpack.c.bf16 (!%p253_p9), %v783_v21, %v782_v20  ;;  %v786_v35 = vld [vmem:[%s1884_s6 + $0x40] sm:$0xff] (!%p253_p9)  ;;  %v1633_v39 = vpack.c.bf16 (!%p253_p9), %v785_v32, %v784_v31  ;;  %v1388_v40 = vld [vmem:[%s1882_s4 + $0x8] sm:$0xff] (!%p253_p9)   ;;  %v1389_v44 = vld [vmem:[%s1882_s4 + $0x10] sm:$0xff] (!%p253_p9)   ;;  %s1461_s21 = smov (!%p253_p9), [#allocation2]  }
  0x12   : > { %v788_v46 = vld [vmem:[%s1884_s6 + $0x50] sm:$0xff] (!%p253_p9)  ;;  %v789_v47 = vld [vmem:[%s1884_s6 + $0x58] sm:$0xff] (!%p253_p9)  ;;  %v1656_v49 = vpack.c.bf16 (!%p253_p9), %v787_v36, %v786_v35  ;;  %1206 = vmatprep.subr.bf16.mxu1 (!%p253_p9), %v1388_v40  ;;  %v790_v56 = vld [vmem:[%s1884_s6 + $0x60] sm:$0xff] (!%p253_p9) }
  0x13   : > { %1187 = vmatpush3.bf16.msra.mxu0 (!%p253_p9), %v1386_v1  ;;  %v1662_v54 = vpack.c.bf16 (!%p253_p9), %v789_v47, %v788_v46  ;;  %v1390_v55 = vld [vmem:[%s1882_s4 + $0x18] sm:$0xff] (!%p253_p9)   ;;  %v791_v57 = vld [vmem:[%s1884_s6 + $0x68] sm:$0xff] (!%p253_p9)  ;;  %v1391_v60 = vld [vmem:[%s1882_s4 + $0x20] sm:$0xff] (!%p253_p9)  }
  0x14   : > { %1293 = vmatprep.subr.bf16.mxu0 (!%p253_p9), %v1565_v5  ;;  %v1684_v63 = vpack.c.bf16 (!%p253_p9), %v791_v57, %v790_v56  ;;  %v792_v1 = vld [vmem:[%s1884_s6 + $0x70] sm:$0xff] (!%p253_p9)  ;;  %v793_v2 = vld [vmem:[%s1884_s6 + $0x78] sm:$0xff] (!%p253_p9)  ;;  %v1392_v3 = vld [vmem:[%s1882_s4 + $0x28] sm:$0xff] (!%p253_p9)  }
  0x15   : > { %s1893_s15 = smov (!%p290_p10, %s1064_s15), 31  ;;  %1207 = vmatpush3.bf16.msra.mxu1 %v1388_v40  ;;  %v1699_v7 = vpack.c.bf16 %v793_v2, %v792_v1  ;;  %v1747_v31 = vld [vmem:[%s1881_s3] ss:$0 sm:$0xff] }
  0x16   : > { %s1065_s22 = sshll.u32 %s1893_s15, 3  ;;  %1208 = vmatprep.subr.bf16.mxu1 %v1389_v44 }
  0x17   : > { %s1570_s8 = scalar_lea.vmem %s1878_s0, %s1065_s22  ;;  %s1591_s20 = scalar_lea.vmem %s1879_s1, %s1065_s22 }
  0x18   : > { %v303_v9 = vld [vmem:[%s1570_s8] sm:$0xff]  ;;  %v304_v10 = vld [vmem:[%s1570_s8 + $0x8] sm:$0xff]  ;;  %v305_v11 = vld [vmem:[%s1570_s8 + $0x10] sm:$0xff] }
  0x19   : > { %v319_v12 = vpack.c.bf16 %v304_v10, %v303_v9  ;;  %v306_v13 = vld [vmem:[%s1570_s8 + $0x18] sm:$0xff]  ;;  %v307_v14 = vld [vmem:[%s1570_s8 + $0x20] sm:$0xff]  ;;  %v308_v15 = vld [vmem:[%s1570_s8 + $0x28] sm:$0xff]  ;;  %1209 = vmatpush3.bf16.msra.mxu1 %v1389_v44 }
  0x1a   : > { %v320_v16 = vpack.c.bf16 %v306_v13, %v305_v11  ;;  %v321_v17 = vpack.c.bf16 %v308_v15, %v307_v14  ;;  %v309_v19 = vld [vmem:[%s1570_s8 + $0x30] sm:$0xff]  ;;  %v310_v22 = vld [vmem:[%s1570_s8 + $0x38] sm:$0xff]  ;;  %v664_v23 = vld [vmem:[%s1591_s20] sm:$0xff]  ;;  %1210 = vmatprep.subr.bf16.mxu1 %v1390_v55 }
  0x1b   : > { %1188 = vmatprep.mubr.msk.bf16.mxu0 %vm350_vm0, %v319_v12  ;;  %v666_v24 = vld [vmem:[%s1591_s20 + $0x10] sm:$0xff]  ;;  %v311_v25 = vld [vmem:[%s1570_s8 + $0x40] sm:$0xff]  ;;  %v312_v26 = vld [vmem:[%s1570_s8 + $0x48] sm:$0xff]  ;;  %683 = vperm.xlu0 %1383, %v664_v23   ;;  %v322_v30 = vpack.c.bf16 %v310_v22, %v309_v19  ;;  %v680_v12 = vlaneseq }
  0x1c   : > { %1189 = vmatmul.mubr.msk.bf16.vlgmr.msra.gmra.mrb[0].mxu0 %vm350_vm0, %v320_v16  ;;  %689 = vperm.xlu1 %1384, %v666_v24   ;;  %v665_v27 = vld [vmem:[%s1591_s20 + $0x8] sm:$0xff]  ;;  %v667_v28 = vld [vmem:[%s1591_s20 + $0x18] sm:$0xff]  ;;  %v323_v33 = vpack.c.bf16 %v312_v26, %v311_v25  ;;  %v668_v34 = vld [vmem:[%s1591_s20 + $0x20] sm:$0xff]  ;;  %v1460_v16 = vmov 1.0  }
  0x1d   : > { %1192 = vmatprep.mubr.msk.bf16.mxu0 %vm350_vm0, %v321_v17  ;;  %1295 = vmatpush3.bf16.msra.mxu0 %v1565_v5  ;;  %v313_v37 = vld [vmem:[%s1570_s8 + $0x50] sm:$0xff]  ;;  %v669_v38 = vld [vmem:[%s1591_s20 + $0x28] sm:$0xff]  ;;  %v314_v41 = vld [vmem:[%s1570_s8 + $0x58] sm:$0xff]  ;;  %v1714_v13 = vand.u32 127, %v680_v12 }
  0x1e   : > { %1297 = vmatprep.subr.bf16.mxu0 %v1594_v18  ;;  %v315_v42 = vld [vmem:[%s1570_s8 + $0x60] sm:$0xff]  ;;  %v316_v43 = vld [vmem:[%s1570_s8 + $0x68] sm:$0xff]  ;;  %v670_v45 = vld [vmem:[%s1591_s20 + $0x30] sm:$0xff]  ;;  %v324_v50 = vpack.c.bf16 %v314_v41, %v313_v37  ;;  %1211 = vmatpush3.bf16.msra.mxu1 %v1390_v55 }
  0x1f   : > { %686 = vperm.xlu0 %1383, %v665_v27   ;;  %v671_v48 = vld [vmem:[%s1591_s20 + $0x38] sm:$0xff]  ;;  %v325_v51 = vpack.c.bf16 %v316_v43, %v315_v42  ;;  %v672_v52 = vld [vmem:[%s1591_s20 + $0x40] sm:$0xff]  ;;  %v673_v53 = vld [vmem:[%s1591_s20 + $0x48] sm:$0xff]  ;;  %1212 = vmatprep.subr.bf16.mxu1 %v1391_v60 }
  0x20   : > { %692 = vperm.xlu1 %1384, %v667_v28   ;;  %v317_v58 = vld [vmem:[%s1570_s8 + $0x70] sm:$0xff]  ;;  %v318_v59 = vld [vmem:[%s1570_s8 + $0x78] sm:$0xff]  ;;  %v676_v4 = vld [vmem:[%s1591_s20 + $0x60] sm:$0xff]  ;;  %s1063_s8 = sshll.u32 %s286_s29, 7 }
  0x21   : > { %1299 = vmatpush3.bf16.msra.mxu0 %v1594_v18  ;;  %v674_v61 = vld [vmem:[%s1591_s20 + $0x50] sm:$0xff]  ;;  %v675_v62 = vld [vmem:[%s1591_s20 + $0x58] sm:$0xff]  ;;  %v326_v0 = vpack.c.bf16 %v318_v59, %v317_v58  ;;  %v677_v8 = vld [vmem:[%s1591_s20 + $0x68] sm:$0xff]  ;;  %s1796_s13 = scalar_lea.vmem [#allocation2], %s1063_s8 }
  0x22   : > { %1301 = vmatprep.subr.bf16.mxu0 %v1614_v29  ;;  %v678_v6 = vld [vmem:[%s1591_s20 + $0x70] sm:$0xff]  ;;  %1213 = vmatpush3.bf16.msra.mxu1 %v1391_v60  ;;  %v679_v9 = vld [vmem:[%s1591_s20 + $0x78] sm:$0xff]  ;;  %s985_s16 = sshll.u32 %s1796_s13, 4  ;;  %s1399_s20 = sshll.u32 %s1461_s21, 4  ;;  %s1831_s16 = int_to_ptr.vmem [resolvable:$true] %s985_s16  ;;  %s1400_s20 = int_to_ptr.vmem [resolvable:$false] %s1399_s20 }
  0x23   : > { %695 = vperm.xlu0 %1383, %v668_v34   ;;  %1214 = vmatprep.subr.bf16.mxu1 %v1392_v3  ;;  %v1393_v10 = vld [vmem:[%s1882_s4 + $0x30] sm:$0xff]   ;;  %v1394_v11 = vld [vmem:[%s1882_s4 + $0x38] sm:$0xff]   ;;  %s1395_s19 = scalar_lea.vmem %s1831_s16, 2048  ;;  %s1401_s23 = scalar_lea.vmem %s1400_s20, 4096 }
  0x24   : > { %1193 = vmatmul.mubr.msk.bf16.gmra.mrb[4].mxu0 %vm350_vm0, %v322_v30  ;;  %698 = vperm.xlu1 %1384, %v669_v38   ;;  %p1396_p11 = scmp.ne.s32.totalorder %s1831_s16, %s1395_s19  ;;  %p1402_p0 = scmp.lt.s32.totalorder %s1831_s16, %s1400_s20 }
  0x25   : > { %1196 = vmatprep.mubr.msk.bf16.mxu0 %vm350_vm0, %v323_v33  ;;  %1303 = vmatpush3.bf16.msra.mxu0 %v1614_v29  ;;  %p1403_p1 = scmp.lt.s32.totalorder %s1401_s23, %s1395_s19 }
  0x26   : > { %1305 = vmatprep.subr.bf16.mxu0 %v1633_v39  ;;  %1215 = vmatpush3.bf16.msra.mxu1 %v1392_v3  ;;  %p1397_p12 = pnand %p1396_p11, %p1542_p5 }
  0x27   : > { %701 = vperm.xlu0 %1383, %v670_v45   ;;  %1216 = vmatprep.subr.bf16.mxu1 %v1393_v10  ;;  %p1404_p2 = por %p1403_p1, %p1402_p0 }
  0x28   : > { %704 = vperm.xlu1 %1384, %v671_v48   ;;  %p1398_p13 = pneg %p1397_p12 }
  0x29   : > { %1307 = vmatpush3.bf16.msra.mxu0 %v1633_v39 }
  0x2a   : > { %1309 = vmatprep.subr.bf16.mxu0 %v1656_v49  ;;  %1217 = vmatpush3.bf16.msra.mxu1 %v1393_v10  ;;  %p1405_p3 = pnand %p1404_p2, %p1398_p13 }
  0x2b   : > { %707 = vperm.xlu0 %1383, %v672_v52   ;;  %1218 = vmatprep.subr.bf16.mxu1 %v1394_v11 }
  0x2c   : > { %1197 = vmatmul.mubr.msk.bf16.gmra.mrb[8].mxu0 %vm350_vm0, %v324_v50  ;;  %710 = vperm.xlu1 %1384, %v673_v53  }
  0x2d   : > { %1200 = vmatprep.mubr.msk.bf16.mxu0 %vm350_vm0, %v325_v51  ;;  %1311 = vmatpush3.bf16.msra.mxu0 %v1656_v49 }
  0x2e   : > { %1313 = vmatprep.subr.bf16.mxu0 %v1662_v54  ;;  %1219 = vmatpush3.bf16.msra.mxu1 %v1394_v11 }
  0x2f   : > { %713 = vperm.xlu0 %1383, %v674_v61   ;;  %1324 = vmatprep.subr.bf16.mxu1 %v1565_v5 }
  0x30   : > { %716 = vperm.xlu1 %1384, %v675_v62  }
  0x31   : > { %1315 = vmatpush3.bf16.msra.mxu0 %v1662_v54 }
  0x32   : > { %1317 = vmatprep.subr.bf16.mxu0 %v1684_v63 }
  0x33   : > { %719 = vperm.xlu0 %1383, %v676_v4  }
  0x34   : > { %1201 = vmatmul.mubr.msk.bf16.gmra.mrb[12].mxu0 %vm350_vm0, %v326_v0  ;;  %725 = vperm.xlu1 %1384, %v678_v6  }
  0x35   : > { %1319 = vmatpush3.bf16.msra.mxu0 %v1684_v63 }
  0x36   : > { %1321 = vmatprep.subr.bf16.mxu0 %v1699_v7 }
  0x37   : > { %722 = vperm.xlu0 %1383, %v677_v8  }
  0x38   : > { %728 = vperm.xlu1 %1384, %v679_v9  }
  0x39   : > { %1323 = vmatpush3.bf16.msra.mxu0 %v1699_v7 }
  0x9a   : > { %v684_v14 = vpop.permute.xlu0 %683 }
  0x9b   : > { %v690_v15 = vpop.permute.xlu1 %689  ;;  %vm730_vm1 = vcmp.eq.s32.totalorder %v1714_v13, %v684_v14 }
  0x9c   : > { %1268 = vmatprep.mubr.msk.f32.mxu0 %vm730_vm1, %v1460_v16  ;;  %vm732_vm2 = vcmp.eq.s32.totalorder %v1714_v13, %v690_v15 }
  0x9e   : > { %v687_v17 = vpop.permute.xlu0 %686 }
  0x9f   : > { %v693_v19 = vpop.permute.xlu1 %692  ;;  %vm731_vm3 = vcmp.eq.s32.totalorder %v1714_v13, %v687_v17 }
  0xa0   : > { %1269 = vmatmul.mubr.msk.f32.vlgmr.msra.gmra.mrb[16].mxu0 %vm731_vm3, %v1460_v16  ;;  %vm733_vm4 = vcmp.eq.s32.totalorder %v1714_v13, %v693_v19 }
  0xa1   : > { %1271 = vmatprep.mubr.msk.f32.mxu0 %vm732_vm2, %v1460_v16 }
  0xa2   : > { %v696_v20 = vpop.permute.xlu0 %695 }
  0xa3   : > { %v699_v21 = vpop.permute.xlu1 %698  ;;  %vm734_vm5 = vcmp.eq.s32.totalorder %v1714_v13, %v696_v20 }
  0xa4   : > { %1272 = vmatmul.mubr.msk.f32.gmra.mrb[18].mxu0 %vm733_vm4, %v1460_v16  ;;  %vm735_vm6 = vcmp.eq.s32.totalorder %v1714_v13, %v699_v21 }
  0xa5   : > { %1274 = vmatprep.mubr.msk.f32.mxu0 %vm734_vm5, %v1460_v16 }
  0xa6   : > { %v702_v22 = vpop.permute.xlu0 %701 }
  0xa7   : > { %v705_v23 = vpop.permute.xlu1 %704  ;;  %vm736_vm7 = vcmp.eq.s32.totalorder %v1714_v13, %v702_v22 }
  0xa8   : > { %1275 = vmatmul.mubr.msk.f32.gmra.mrb[20].mxu0 %vm735_vm6, %v1460_v16  ;;  %vm737_vm8 = vcmp.eq.s32.totalorder %v1714_v13, %v705_v23 }
  0xa9   : > { %1277 = vmatprep.mubr.msk.f32.mxu0 %vm736_vm7, %v1460_v16 }
  0xaa   : > { %v708_v24 = vpop.permute.xlu0 %707 }
  0xab   : > { %v711_v25 = vpop.permute.xlu1 %710  ;;  %vm738_vm9 = vcmp.eq.s32.totalorder %v1714_v13, %v708_v24 }
  0xac   : > { %1278 = vmatmul.mubr.msk.f32.gmra.mrb[22].mxu0 %vm737_vm8, %v1460_v16  ;;  %vm739_vm10 = vcmp.eq.s32.totalorder %v1714_v13, %v711_v25 }
  0xad   : > { %1280 = vmatprep.mubr.msk.f32.mxu0 %vm738_vm9, %v1460_v16 }
  0xae   : > { %v714_v26 = vpop.permute.xlu0 %713 }
  0xaf   : > { %vm740_vm11 = vcmp.eq.s32.totalorder %v1714_v13, %v714_v26  ;;  %v717_v27 = vpop.permute.xlu1 %716 }
  0xb0   : > { %1281 = vmatmul.mubr.msk.f32.gmra.mrb[24].mxu0 %vm739_vm10, %v1460_v16  ;;  %vm741_vm12 = vcmp.eq.s32.totalorder %v1714_v13, %v717_v27 }
  0xb1   : > { %1283 = vmatprep.mubr.msk.f32.mxu0 %vm740_vm11, %v1460_v16 }
  0xb2   : > { %v720_v28 = vpop.permute.xlu0 %719 }
  0xb3   : > { %vm742_vm13 = vcmp.eq.s32.totalorder %v1714_v13, %v720_v28 }
  0xb4   : > { %1284 = vmatmul.mubr.msk.f32.gmra.mrb[26].mxu0 %vm741_vm12, %v1460_v16 }
  0xb5   : > { %1286 = vmatprep.mubr.msk.f32.mxu0 %vm742_vm13, %v1460_v16 }
  0xb6   : > { %v723_v30 = vpop.permute.xlu0 %722 }
  0xb7   : > { %vm743_vm14 = vcmp.eq.s32.totalorder %v1714_v13, %v723_v30  ;;  %v726_v30 = vpop.permute.xlu1 %725 }
  0xb8   : > { %1287 = vmatmul.mubr.msk.f32.gmra.mrb[28].mxu0 %vm743_vm14, %v1460_v16  ;;  %vm744_vm15 = vcmp.eq.s32.totalorder %v1714_v13, %v726_v30 }
  0xef   : > { %v1190_v32 = vpop.f32.mrb[0].mxu0 }
  0xf0   : > { %v418_v33 = vadd.f32 %v1190_v32, %v1747_v31  ;;  %v409_v34 = vpop.f32.mrb[1].mxu0 }
  0xf1   : > { %v410_v35 = vadd.f32 %v1747_v31, %v409_v34  ;;  %v1191_v36 = vpop.f32.mrb[2].mxu0 }
  0xf2   : > { %v421_v37 = vadd.f32 %v1191_v36, %v1747_v31  ;;  %v412_v38 = vpop.f32.mrb[3].mxu0  ;;  %v474_v41 = vmax.f32 %v418_v33, 0.0 }
  0xf3   : > { %v413_v40 = vadd.f32 %v1747_v31, %v412_v38  ;;  %v472_v43 = vmax.f32 %v410_v35, 0.0 }
  0xf4   : > { %v475_v42 = vmax.f32 %v421_v37, 0.0 }
  0xf5   : > { %v473_v44 = vmax.f32 %v413_v40, 0.0 }
  0xf6   : > { %v489_v45 = vpack.c.bf16 %v475_v42, %v474_v41 }
  0xf7   : > { %v1194_v46 = vpop.f32.mrb[4].mxu0  ;;  %v488_v47 = vpack.c.bf16 %v473_v44, %v472_v43 }
  0xf8   : > { %v434_v48 = vadd.f32 %v1194_v46, %v1747_v31  ;;  %v425_v50 = vpop.f32.mrb[5].mxu0 }
  0xf9   : > { %v426_v51 = vadd.f32 %v1747_v31, %v425_v50  ;;  %v1195_v52 = vpop.f32.mrb[6].mxu0  ;;  %1220 = vmatprep.mubr.bf16.mxu1 %v488_v47 }
  0xfa   : > { %v437_v53 = vadd.f32 %v1195_v52, %v1747_v31  ;;  %v428_v55 = vpop.f32.mrb[7].mxu0  ;;  %1221 = vmatmul.mubr.bf16.vlgmr.msra.gmra.mrb[0].mxu1 %v489_v45  ;;  %v478_v57 = vmax.f32 %v434_v48, 0.0 }
  0xfb   : > { %v429_v56 = vadd.f32 %v1747_v31, %v428_v55  ;;  %1332 = vmatpush3.bf16.msra.mxu1 %v1565_v5  ;;  %v476_v59 = vmax.f32 %v426_v51, 0.0 }
  0xfc   : > { %v479_v58 = vmax.f32 %v437_v53, 0.0  ;;  %1325 = vmatprep.subr.bf16.mxu1 %v1594_v18 }
  0xfd   : > { %v477_v60 = vmax.f32 %v429_v56, 0.0 }
  0xfe   : > { %v491_v61 = vpack.c.bf16 %v479_v58, %v478_v57 }
  0xff   : > { %v490_v62 = vpack.c.bf16 %v477_v60, %v476_v59  ;;  %1333 = vmatpush3.bf16.msra.mxu1 %v1594_v18  ;;  %v1198_v0 = vpop.f32.mrb[8].mxu0 }
 0x100   : > { %v450_v1 = vadd.f32 %v1198_v0, %v1747_v31  ;;  %v441_v2 = vpop.f32.mrb[9].mxu0  ;;  %1326 = vmatprep.subr.bf16.mxu1 %v1614_v29 }
 0x101   : > { %v442_v3 = vadd.f32 %v1747_v31, %v441_v2  ;;  %v1199_v4 = vpop.f32.mrb[10].mxu0  ;;  %1224 = vmatprep.mubr.bf16.mxu1 %v490_v62 }
 0x102   : > { %v453_v5 = vadd.f32 %v1199_v4, %v1747_v31  ;;  %v444_v6 = vpop.f32.mrb[11].mxu0  ;;  %1225 = vmatmul.mubr.bf16.gmra.mrb[4].mxu1 %v491_v61  ;;  %v482_v9 = vmax.f32 %v450_v1, 0.0 }
 0x103   : > { %v445_v8 = vadd.f32 %v1747_v31, %v444_v6  ;;  %1334 = vmatpush3.bf16.msra.mxu1 %v1614_v29  ;;  %v480_v10 = vmax.f32 %v442_v3, 0.0 }
 0x104   : > { %v483_v18 = vmax.f32 %v453_v5, 0.0  ;;  %1327 = vmatprep.subr.bf16.mxu1 %v1633_v39 }
 0x105   : > { %v481_v11 = vmax.f32 %v445_v8, 0.0 }
 0x106   : > { %v493_v12 = vpack.c.bf16 %v483_v18, %v482_v9 }
 0x107   : > { %v492_v14 = vpack.c.bf16 %v481_v11, %v480_v10  ;;  %1335 = vmatpush3.bf16.msra.mxu1 %v1633_v39  ;;  %v1202_v15 = vpop.f32.mrb[12].mxu0 }
 0x108   : > { %v466_v17 = vadd.f32 %v1202_v15, %v1747_v31  ;;  %v457_v19 = vpop.f32.mrb[13].mxu0  ;;  %1328 = vmatprep.subr.bf16.mxu1 %v1656_v49 }
 0x109   : > { %v458_v20 = vadd.f32 %v1747_v31, %v457_v19  ;;  %v1203_v21 = vpop.f32.mrb[14].mxu0  ;;  %1228 = vmatprep.mubr.bf16.mxu1 %v492_v14 }
 0x10a   : > { %v469_v29 = vadd.f32 %v1203_v21, %v1747_v31  ;;  %v460_v22 = vpop.f32.mrb[15].mxu0  ;;  %1229 = vmatmul.mubr.bf16.gmra.mrb[8].mxu1 %v493_v12  ;;  %v486_v24 = vmax.f32 %v466_v17, 0.0 }
 0x10b   : > { %v461_v23 = vadd.f32 %v1747_v31, %v460_v22  ;;  %1336 = vmatpush3.bf16.msra.mxu1 %v1656_v49  ;;  %v484_v25 = vmax.f32 %v458_v20, 0.0  ;;  %v729_v49 = vpop.permute.xlu1 %728 }
 0x10c   : > { %v487_v39 = vmax.f32 %v469_v29, 0.0  ;;  %1329 = vmatprep.subr.bf16.mxu1 %v1662_v54  ;;  %vm745_vm0 = vcmp.eq.s32.totalorder %v1714_v13, %v729_v49  ;;  %v1788_v13 = vld [vmem:[%s1883_s5] ss:$0 sm:$0xff] }
 0x10d   : > { %v485_v26 = vmax.f32 %v461_v23, 0.0 }
 0x10e   : > { %v495_v27 = vpack.c.bf16 %v487_v39, %v486_v24 }
 0x10f   : > { %v494_v28 = vpack.c.bf16 %v485_v26, %v484_v25  ;;  %1337 = vmatpush3.bf16.msra.mxu1 %v1662_v54 }
 0x110   : > { %1330 = vmatprep.subr.bf16.mxu1 %v1684_v63 }
 0x111   : > { %1232 = vmatprep.mubr.bf16.mxu1 %v494_v28 }
 0x112   : > { %1233 = vmatmul.mubr.bf16.gmra.mrb[12].mxu1 %v495_v27 }
 0x113   : > { %1338 = vmatpush3.bf16.msra.mxu1 %v1684_v63  ;;  %1289 = vmatprep.mubr.msk.f32.mxu1 %vm744_vm15, %v1460_v16 }
 0x114   : > { %1331 = vmatprep.subr.bf16.mxu1 %v1699_v7 }
 0x117   : > { %1339 = vmatpush3.bf16.msra.mxu1 %v1699_v7 }
 0x11a   : > { %1290 = vmatmul.mubr.msk.f32.vlgmr.msra.gmra.mrb[16].mxu1 %vm745_vm0, %v1460_v16 }
 0x173   : > { %v1270_v54 = vpop.f32.mrb[16].mxu0 }
 0x174   : > { %v860_v31 = vpop.f32.mrb[17].mxu0 }
 0x177   : > { %v1273_v32 = vpop.f32.mrb[18].mxu0 }
 0x178   : > { %v870_v33 = vpop.f32.mrb[19].mxu0 }
 0x17b   : > { %v1276_v34 = vpop.f32.mrb[20].mxu0 }
 0x17c   : > { %v880_v35 = vpop.f32.mrb[21].mxu0 }
 0x17f   : > { %v1279_v63 = vpop.f32.mrb[22].mxu0 }
 0x180   : > { %v890_v36 = vpop.f32.mrb[23].mxu0 }
 0x183   : > { %v1282_v37 = vpop.f32.mrb[24].mxu0 }
 0x184   : > { %v900_v38 = vpop.f32.mrb[25].mxu0 }
 0x187   : > { %v1285_v40 = vpop.f32.mrb[26].mxu0 }
 0x188   : > { %v910_v41 = vpop.f32.mrb[27].mxu0 }
 0x18b   : > { %v1288_v42 = vpop.f32.mrb[28].mxu0 }
 0x18c   : > { %v920_v7 = vpop.f32.mrb[29].mxu0 }
 0x1cd   : > { %v1222_v16 = vpop.f32.mrb[0].mxu1 }
 0x1ce   : > { %v610_v43 = vadd.f32 %v1222_v16, %v1788_v13  ;;  %v601_v44 = vpop.f32.mrb[1].mxu1 }
 0x1cf   : > { %v602_v45 = vadd.f32 %v1788_v13, %v601_v44  ;;  %v1223_v46 = vpop.f32.mrb[2].mxu1 }
 0x1d0   : > { %v941_v47 = vmul.f32 %v870_v33, %v610_v43  ;;  %v613_v48 = vadd.f32 %v1223_v46, %v1788_v13  ;;  %v604_v50 = vpop.f32.mrb[3].mxu1 }
 0x1d1   : > { %v939_v51 = vmul.f32 %v860_v31, %v602_v45  ;;  %v605_v52 = vadd.f32 %v1788_v13, %v604_v50 }
 0x1d2   : > { %957 = vst [vmem:[%s1796_s13 + $0x10] sm:$0xff] %v941_v47  ;;  %v942_v53 = vmul.f32 %v1273_v32, %v613_v48 }
 0x1d3   : > { %955 = vst [vmem:[%s1796_s13] sm:$0xff] %v939_v51  ;;  %v940_v55 = vmul.f32 %v1270_v54, %v605_v52 }
 0x1d4   : > { %958 = vst [vmem:[%s1796_s13 + $0x18] sm:$0xff] %v942_v53 }
 0x1d5   : > { %956 = vst [vmem:[%s1796_s13 + $0x8] sm:$0xff] %v940_v55  ;;  %v1226_v56 = vpop.f32.mrb[4].mxu1 }
 0x1d6   : > { %v626_v57 = vadd.f32 %v1226_v56, %v1788_v13  ;;  %v617_v58 = vpop.f32.mrb[5].mxu1 }
 0x1d7   : > { %v618_v59 = vadd.f32 %v1788_v13, %v617_v58  ;;  %v1227_v60 = vpop.f32.mrb[6].mxu1 }
 0x1d8   : > { %v945_v61 = vmul.f32 %v890_v36, %v626_v57  ;;  %v629_v62 = vadd.f32 %v1227_v60, %v1788_v13  ;;  %v620_v0 = vpop.f32.mrb[7].mxu1 }
 0x1d9   : > { %v943_v1 = vmul.f32 %v880_v35, %v618_v59  ;;  %v621_v2 = vadd.f32 %v1788_v13, %v620_v0 }
 0x1da   : > { %961 = vst [vmem:[%s1796_s13 + $0x30] sm:$0xff] %v945_v61  ;;  %v946_v3 = vmul.f32 %v1279_v63, %v629_v62 }
 0x1db   : > { %959 = vst [vmem:[%s1796_s13 + $0x20] sm:$0xff] %v943_v1  ;;  %v944_v4 = vmul.f32 %v1276_v34, %v621_v2 }
 0x1dc   : > { %962 = vst [vmem:[%s1796_s13 + $0x38] sm:$0xff] %v946_v3 }
 0x1dd   : > { %960 = vst [vmem:[%s1796_s13 + $0x28] sm:$0xff] %v944_v4  ;;  %v1230_v5 = vpop.f32.mrb[8].mxu1 }
 0x1de   : > { %v642_v6 = vadd.f32 %v1230_v5, %v1788_v13  ;;  %v633_v8 = vpop.f32.mrb[9].mxu1 }
 0x1df   : > { %v634_v9 = vadd.f32 %v1788_v13, %v633_v8  ;;  %v1231_v18 = vpop.f32.mrb[10].mxu1 }
 0x1e0   : > { %v949_v10 = vmul.f32 %v910_v41, %v642_v6  ;;  %v645_v11 = vadd.f32 %v1231_v18, %v1788_v13  ;;  %v636_v12 = vpop.f32.mrb[11].mxu1 }
 0x1e1   : > { %v947_v14 = vmul.f32 %v900_v38, %v634_v9  ;;  %v637_v15 = vadd.f32 %v1788_v13, %v636_v12 }
 0x1e2   : > { %965 = vst [vmem:[%s1796_s13 + $0x50] sm:$0xff] %v949_v10  ;;  %v950_v17 = vmul.f32 %v1285_v40, %v645_v11 }
 0x1e3   : > { %963 = vst [vmem:[%s1796_s13 + $0x40] sm:$0xff] %v947_v14  ;;  %v948_v19 = vmul.f32 %v1282_v37, %v637_v15 }
 0x1e4   : > { %966 = vst [vmem:[%s1796_s13 + $0x58] sm:$0xff] %v950_v17 }
 0x1e5   : > { %964 = vst [vmem:[%s1796_s13 + $0x48] sm:$0xff] %v948_v19  ;;  %v1234_v20 = vpop.f32.mrb[12].mxu1 }
 0x1e6   : > { %v649_v21 = vpop.f32.mrb[13].mxu1  ;;  %v658_v27 = vadd.f32 %v1234_v20, %v1788_v13 }
 0x1e7   : > { %v650_v29 = vadd.f32 %v1788_v13, %v649_v21  ;;  %v1235_v22 = vpop.f32.mrb[14].mxu1 }
 0x1e8   : > { %v652_v23 = vpop.f32.mrb[15].mxu1  ;;  %v661_v26 = vadd.f32 %v1235_v22, %v1788_v13 }
 0x1e9   : > { %v951_v24 = vmul.f32 %v920_v7, %v650_v29  ;;  %v653_v39 = vadd.f32 %v1788_v13, %v652_v23 }
 0x1eb   : > { %967 = vst [vmem:[%s1796_s13 + $0x60] sm:$0xff] %v951_v24  ;;  %v952_v25 = vmul.f32 %v1288_v42, %v653_v39 }
 0x1ed   : > { %968 = vst [vmem:[%s1796_s13 + $0x68] sm:$0xff] %v952_v25  ;;  %v1291_v28 = vpop.f32.mrb[16].mxu1 }
 0x1ee   : > { %v954_v30 = vmul.f32 %v1291_v28, %v661_v26  ;;  %v930_v49 = vpop.f32.mrb[17].mxu1 }
 0x1ef   : > { %v953_v54 = vmul.f32 %v930_v49, %v658_v27 }
 0x1f0   : > { %970 = vst [vmem:[%s1796_s13 + $0x78] sm:$0xff] %v954_v30 }
 0x1f1   : > { %969 = vst [vmem:[%s1796_s13 + $0x70] sm:$0xff] %v953_v54 }
 0x1f2   : > { %1408 = shalt.err (!%p1405_p3)
}
 0x1f3   : > { %s1409_s29 = scalar_lea.hbm %s1829_s18, 2048  ;;  %s1413_s8 = scalar_lea.hbm %s1885_s7, 4096 }
 0x1f4   : > { %p1410_p4 = scmp.ne.s32.totalorder %s1829_s18, %s1409_s29  ;;  %p1414_p9 = scmp.lt.u32.totalorder %s1829_s18, %s1885_s7 }
 0x1f5   : > { %p1415_p10 = scmp.lt.u32.totalorder %s1413_s8, %s1409_s29  ;;  %p1417_p12 = scmp.lt.u32.totalorder %s1409_s29, %s1829_s18 }
 0x1f6   : > { %p1411_p7 = pnand %p1410_p4, %p1542_p5 }
 0x1f7   : > { %p1416_p11 = por %p1415_p10, %p1414_p9 }
 0x1f8   : > { %p1412_p8 = pneg %p1411_p7 }
 0x1f9   : > { %p1418_p13 = por %p1417_p12, %p1416_p11 }
 0x1fb   : > { %p1419_p0 = pnand %p1418_p13, %p1412_p8 }
 0x1fd   : > { %1422 = shalt.err (!%p1419_p0)
}
 0x1fe   : > { %s1462_s15 = smov 128   ;;  %s1463_s17 = smov 8  }
 0x1ff   : > { %1340 = dma.vmem_to_hbm [thread:$0]  (%p1542_p5), %s1831_s16, 2048, %s1829_s18, %s1837_s28, %s1462_s15, %s1462_s15, %s1463_s17  }
 0x200 PF: > { %p1346_p1 = scmp.ge.s32.totalorder %s1457_s27, 2  ;;  %s1000_s19 = sand.u32 1, %s1445_s24  }
 0x201   : > { %s1001_s21 = scalar_lea.sflag [#allocation3], %s1000_s19 }
 0x202   : > { %p1343_p2 = pnand %p1346_p1, %p1546_p6 }
 0x204   : > { %1440 = dma.done.wait (!%p1343_p2), %s1001_s21, 2048  }
 0x205   : > { %1442 = vsyncadd (!%p1343_p2), %s1001_s21, 4294965248  ;;  %p17_p3 = scmp.ge.s32.totalorder %s1529_s30, 4   ;;  %s1888_s24 = smov %s1449_s25 }
 0x206   : > { %s1889_s25 = smov %s1453_s26  ;;  %s1890_s26 = smov %s1540_s10 }
 0x207   : > { %s1891_s27 = smov %s1529_s30  ;;  %19 = sbr.rel (!%p17_p3) target bundleno = 3 (0x3), region = 86 }
 0x20e   :  { %1006 = vsyncpa [#allocation3], 1 }
 0x20f   :  { %1008 = vsyncpa [#allocation3 + $0x1], 1 }

</bundles_post_ra>
